<compile_context>
chip_gen: v7x
topology: tpu7x:2x2x1
jax: 0.10.0
libtpu: 0.0.40
codegen_flags: <defaults>
</compile_context>

<pallas_src>
import functools

import jax
import jax.numpy as jnp
from jax.experimental import pallas as pl
from jax.experimental.pallas import tpu as pltpu


# --------------------------------------------------------------------------- #
# Kernels
# --------------------------------------------------------------------------- #

def _addnorm_kernel(*refs, eps, features, has_residual):
    """Generic row-normalization kernel. Block layout: (tile_rows, features)."""
    if has_residual:
        x_ref, r_ref, alpha_ref, bias_ref, o_ref = refs
    else:
        x_ref, alpha_ref, bias_ref, o_ref = refs
        r_ref = None

    x = x_ref[...].astype(jnp.float32)
    if r_ref is not None:
        x = x + r_ref[...].astype(jnp.float32)

    mean = jnp.mean(x, axis=-1, keepdims=True)
    diff = x - mean
    # torch.std defaults to unbiased (ddof=1) -> divide by (N - 1).
    var = jnp.sum(diff * diff, axis=-1, keepdims=True) * jnp.float32(1.0 / (features - 1))
    # eps is added to the std (not the variance) to match the torch module exactly.
    # Exact per-row reciprocal: the divide is on a (tile_rows, 1) tensor, so it is
    # essentially free and keeps ~1e-6 parity (no approximate EUP reciprocal).
    inv = jnp.float32(1.0) / (jnp.sqrt(var) + jnp.float32(eps))

    y = (diff * inv) * alpha_ref[...].astype(jnp.float32) + bias_ref[...].astype(jnp.float32)
    o_ref[...] = y.astype(o_ref.dtype)


def _addnorm_packed_kernel(*refs, eps, features, groups, has_residual):
    """Lane-packed kernel for small feature dims (features * groups == 128).

    `groups` logical rows are folded into the 128-wide lane axis so every HBM
    load/store and VMEM tile is lane-dense. Per-row stats are computed per
    length-`features` lane segment with static slices (exact f32, no MXU).
    """
    if has_residual:
        x_ref, r_ref, alpha_ref, bias_ref, o_ref = refs
    else:
        x_ref, alpha_ref, bias_ref, o_ref = refs
        r_ref = None

    x = x_ref[...].astype(jnp.float32)          # (tile_rows, groups * features)
    if r_ref is not None:
        x = x + r_ref[...].astype(jnp.float32)

    inv_n = jnp.float32(1.0 / features)
    inv_nm1 = jnp.float32(1.0 / (features - 1))
    parts = []
    for j in range(groups):                     # static unroll, groups <= 16
        seg = x[:, j * features:(j + 1) * features]
        mean = jnp.sum(seg, axis=-1, keepdims=True) * inv_n
        diff = seg - mean
        var = jnp.sum(diff * diff, axis=-1, keepdims=True) * inv_nm1
        inv = jnp.float32(1.0) / (jnp.sqrt(var) + jnp.float32(eps))
        parts.append(diff * inv)
    y = jnp.concatenate(parts, axis=-1)
    y = y * alpha_ref[...].astype(jnp.float32) + bias_ref[...].astype(jnp.float32)
    o_ref[...] = y.astype(o_ref.dtype)


# --------------------------------------------------------------------------- #
# Sizing helpers
# --------------------------------------------------------------------------- #

def _chip_info():
    """Best-effort TPU generation probe (string compare only; never raises)."""
    kind = ""
    try:
        kind = jax.devices()[0].device_kind.lower()
    except Exception:
        pass
    is_v7 = "v7" in kind
    # Chips with more than one TensorCore visible to a single Pallas grid.
    multi_core = is_v7 or ("v4" in kind) or ("v5p" in kind)
    return is_v7, multi_core


def _pick_tile_rows(rows, feat, in_isz, out_isz, n_in_streams, multi_core):
    """Bytes-budgeted row tiling for this HBM-bound kernel.

    Targets ~4 MiB (f32-equivalent) per x block (bigger blocks amortize the
    ~0.35 us per-grid-step cost toward the HBM roofline), while also budgeting
    the double-buffered in/out DMA blocks plus ~3 block-sized f32 temporaries
    (x_f32, diff, y) that are live during compute.
    """
    align = max(8, 32 // max(in_isz, 1))   # sublane packing: 8 f32 / 16 bf16 / 32 int8
    if rows <= align:
        return rows                        # single full block (always a legal block shape)

    target_x_f32 = 4 << 20                 # ~4 MiB f32-equivalent x block
    work_budget = 30 << 20                 # total VMEM working-set budget per step

    per_row_pipe = feat * (2 * in_isz * n_in_streams + 2 * out_isz)  # double-buffered DMA blocks
    per_row_f32 = feat * 4 * 3                                       # live f32 temporaries
    per_row = per_row_pipe + per_row_f32

    tr = min(target_x_f32 // (feat * 4), work_budget // per_row)
    tr = max(align, (tr // align) * align)

    if tr >= rows:
        tr = rows                          # whole problem fits in one block
        if multi_core and rows >= 2 * align:
            # Split into >=2 grid steps only when there is a second TensorCore to
            # feed (v4/v5p/v7x). On 1-TC chips (v5e/v6e) the grid is a serial loop,
            # so splitting a one-block problem is pure overhead.
            half = -(-rows // 2)
            tr = min(rows, -(-half // align) * align)
    return int(tr)


def _vmem_limit_bytes(tile_rows, feat, in_isz, out_isz, n_in_streams, is_v7):
    """Derive the scoped-VMEM limit from actual need instead of hardcoding it."""
    blk = tile_rows * feat
    need = blk * (2 * in_isz * n_in_streams + 2 * out_isz + 3 * 4)   # DMA bufs + f32 temps
    need += 4 * feat * 4                                             # alpha/bias (2 bufs each)
    cap = (40 << 20) if is_v7 else (64 << 20)   # v7x has only 64 MiB physical VMEM
    return int(min(cap, max(16 << 20, need + (4 << 20))))


# --------------------------------------------------------------------------- #
# Wrapper
# --------------------------------------------------------------------------- #

def _add_and_norm_call(x2d, residual2d, alpha, bias, out_dtype, orig_shape, *,
                       eps, features, groups, tile_rows):
    rows = x2d.shape[0]
    in_isz = jnp.dtype(x2d.dtype).itemsize
    out_isz = jnp.dtype(out_dtype).itemsize
    has_residual = residual2d is not None
    n_in_streams = 2 if has_residual else 1

    is_v7, multi_core = _chip_info()

    if groups > 1:
        rows_w = rows // groups
        feat_w = features * groups                    # == 128 by construction
        x_w = x2d.reshape(rows_w, feat_w)
        r_w = residual2d.reshape(rows_w, feat_w) if has_residual else None
        alpha_w = jnp.tile(alpha.reshape(1, features), (1, groups))
        bias_w = jnp.tile(bias.reshape(1, features), (1, groups))
        kernel = functools.partial(_addnorm_packed_kernel, eps=eps, features=features,
                                   groups=groups, has_residual=has_residual)
    else:
        rows_w = rows
        feat_w = features
        x_w = x2d
        r_w = residual2d
        alpha_w = alpha.reshape(1, features)
        bias_w = bias.reshape(1, features)
        kernel = functools.partial(_addnorm_kernel, eps=eps, features=features,
                                   has_residual=has_residual)

    if tile_rows is None:
        tile_rows = _pick_tile_rows(rows_w, feat_w, in_isz, out_isz, n_in_streams, multi_core)
    tile_rows = int(min(tile_rows, rows_w))

    grid = (pl.cdiv(rows_w, tile_rows),)
    vmem_limit = _vmem_limit_bytes(tile_rows, feat_w, in_isz, out_isz, n_in_streams, is_v7)

    row_spec = pl.BlockSpec((tile_rows, feat_w), lambda i: (i, 0))
    par_spec = pl.BlockSpec((1, feat_w), lambda i: (0, 0))   # resident in VMEM
    in_specs = [row_spec] + ([row_spec] if has_residual else []) + [par_spec, par_spec]
    operands = [x_w] + ([r_w] if has_residual else []) + [alpha_w, bias_w]

    # On v7x, ask for an explicit 2-TensorCore split of the row axis; everywhere
    # else keep plain "parallel" (single-TC chips / megacore handle it natively).
    sem_options = []
    core_parallel = getattr(pltpu, "CORE_PARALLEL", None)
    if is_v7 and core_parallel is not None and grid[0] >= 2:
        sem_options.append((core_parallel,))
    sem_options.append(("parallel",))

    def _call(sem):
        return pl.pallas_call(
            kernel,
            out_shape=jax.ShapeDtypeStruct((rows_w, feat_w), out_dtype),
            grid_spec=pltpu.PrefetchScalarGridSpec(
                num_scalar_prefetch=0,
                grid=grid,
                in_specs=in_specs,
                out_specs=row_spec,
            ),
            compiler_params=pltpu.CompilerParams(
                dimension_semantics=sem,
                vmem_limit_bytes=vmem_limit,
            ),
        )(*operands)

    if len(sem_options) == 1:
        out = _call(sem_options[0])
    else:
        out, last_err = None, None
        for sem in sem_options:
            try:
                out = jax.block_until_ready(_call(sem))
                break
            except Exception as e:   # CORE_PARALLEL rejected -> fall back to "parallel"
                last_err = e
                out = None
        if out is None:
            raise last_err

    return out.reshape(orig_shape)


def add_and_norm(x, alpha, bias, residual=None, *, eps=1e-6, tile_rows=None):
    """Pallas TPU implementation of AddAndNorm.forward.

    x: (..., features); alpha, bias: (features,).
    `residual` (optional, same shape as x) is fused as (x + residual) before
    normalization, saving an extra HBM pass; default None matches the torch
    module's single-input forward exactly.
    Semantics: unbiased std (ddof=1) and eps added to the std, as in the module.
    """
    features = x.shape[-1]
    if features < 2:
        # torch.std(dim=-1) of a single element (unbiased) is NaN; refuse instead.
        raise ValueError("add_and_norm requires features >= 2 (unbiased std).")
    if residual is not None and residual.shape != x.shape:
        raise ValueError("residual must have the same shape as x")

    orig_shape = x.shape
    x2d = x.reshape(-1, features)
    r2d = residual.reshape(-1, features) if residual is not None else None
    rows = x2d.shape[0]

    # Lane packing eligibility: fold g = 128 // features rows into the lane axis
    # when the feature dim under-fills the 128-wide lanes (lane-dense stores are
    # the biggest measured single lever for store-bound kernels).
    groups = 1
    if features < 128 and 128 % features == 0:
        g = 128 // features
        if g <= 16 and rows % g == 0:
            groups = g

    if groups > 1:
        try:
            return _add_and_norm_call(x2d, r2d, alpha, bias, x.dtype, orig_shape,
                                      eps=eps, features=features, groups=groups,
                                      tile_rows=tile_rows)
        except Exception:
            pass  # fall back to the (correct, just lane-sparse) generic layout
    return _add_and_norm_call(x2d, r2d, alpha, bias, x.dtype, orig_shape,
                              eps=eps, features=features, groups=1,
                              tile_rows=tile_rows)


# --------------------------------------------------------------------------- #
# Demo / self-test
# --------------------------------------------------------------------------- #

if __name__ == "__main__":
    key = jax.random.PRNGKey(0)

    def reference(x, alpha, bias, eps):
        mean = jnp.mean(x, axis=-1, keepdims=True)
        std = jnp.sqrt(jnp.sum((x - mean) ** 2, axis=-1, keepdims=True) / (x.shape[-1] - 1))
        return alpha * (x - mean) / (std + eps) + bias

    # 1) Small shape implied by the module: (batch, seq, hidden), norm over hidden.
    #    hidden=32 < 128 exercises the lane-packed path.
    batch, seq, hidden = 2, 8, 32
    k1, k2, k3, k4, k5 = jax.random.split(key, 5)
    x = jax.random.normal(k1, (batch, seq, hidden), dtype=jnp.float32)
    alpha = jnp.ones((hidden,), dtype=jnp.float32)   # nn.Parameter(torch.ones(features))
    bias = jnp.zeros((hidden,), dtype=jnp.float32)   # nn.Parameter(torch.zeros(features))
    out = add_and_norm(x, alpha, bias, eps=1e-6)
    jax.block_until_ready(out)
    ref = reference(x, alpha, bias, 1e-6)
    assert jnp.allclose(out, ref, atol=3e-5, rtol=3e-5), "packed-path mismatch vs reference"

    # 2) Lane-dense feature dim (generic path), non-trivial alpha/bias.
    hidden2 = 256
    x2 = jax.random.normal(k2, (batch, seq, hidden2), dtype=jnp.float32)
    alpha2 = 1.0 + 0.1 * jax.random.normal(k3, (hidden2,), dtype=jnp.float32)
    bias2 = 0.05 * jnp.arange(hidden2, dtype=jnp.float32)
    out2 = add_and_norm(x2, alpha2, bias2, eps=1e-6)
    ref2 = reference(x2, alpha2, bias2, 1e-6)
    assert jnp.allclose(out2, ref2, atol=3e-5, rtol=3e-5), "generic-path mismatch vs reference"

    # 3) Fused residual add + multi-step grid with a masked partial last block.
    rows3, hidden3 = 15, 256                     # tile_rows=8 -> 2 steps, last block partial
    x3 = jax.random.normal(k4, (rows3, hidden3), dtype=jnp.float32)
    r3 = jax.random.normal(k5, (rows3, hidden3), dtype=jnp.float32)
    out3 = add_and_norm(x3, alpha2, bias2, residual=r3, eps=1e-6, tile_rows=8)
    ref3 = reference(x3 + r3, alpha2, bias2, 1e-6)
    assert jnp.allclose(out3, ref3, atol=3e-5, rtol=3e-5), "residual/partial-block mismatch"

    print("KERNEL_OK")
</pallas_src>

<mosaic_0001>
module attributes {stable_mosaic.version = 11 : i64} {
  func.func @_addnorm_packed_kernel(%arg0: i32, %arg1: memref<4x128xf32, #tpu.memory_space<vmem>>, %arg2: memref<1x128xf32, #tpu.memory_space<vmem>>, %arg3: memref<1x128xf32, #tpu.memory_space<vmem>>, %arg4: memref<4x128xf32, #tpu.memory_space<vmem>>) attributes {dimension_semantics = [#tpu.dimension_semantics<parallel>], iteration_bounds = array<i64: 1>, scalar_prefetch = 0 : i64, scratch_operands = 0 : i64, tpu.core_type = #tpu.core_type<tc>, window_params = [{transform_indices = @transform_0, window_bounds = array<i64: 4, 128>}, {pipeline_mode = #tpu.pipeline_mode<synchronous>, transform_indices = @transform_1, window_bounds = array<i64: 1, 128>}, {pipeline_mode = #tpu.pipeline_mode<synchronous>, transform_indices = @transform_2, window_bounds = array<i64: 1, 128>}, {transform_indices = @transform_3, window_bounds = array<i64: 4, 128>}]} {
    %c0 = arith.constant 0 : index
    %c0_0 = arith.constant 0 : index
    %0 = vector.load %arg1[%c0, %c0_0] : memref<4x128xf32, #tpu.memory_space<vmem>>, vector<4x128xf32>
    %1 = vector.extract_strided_slice %0 {offsets = [0, 0], sizes = [4, 32], strides = [1, 1]} : vector<4x128xf32> to vector<4x32xf32>
    %cst = arith.constant dense<0.000000e+00> : vector<4xf32>
    %2 = vector.multi_reduction <add>, %1, %cst [1] : vector<4x32xf32> to vector<4xf32>
    %3 = vector.shape_cast %2 : vector<4xf32> to vector<4x1xf32>
    %cst_1 = arith.constant 3.125000e-02 : f32
    %4 = vector.broadcast %cst_1 : f32 to vector<4x1xf32>
    %5 = arith.mulf %3, %4 : vector<4x1xf32>
    %6 = vector.broadcast %5 : vector<4x1xf32> to vector<4x32xf32>
    %7 = arith.subf %1, %6 : vector<4x32xf32>
    %8 = arith.mulf %7, %7 : vector<4x32xf32>
    %cst_2 = arith.constant dense<0.000000e+00> : vector<4xf32>
    %9 = vector.multi_reduction <add>, %8, %cst_2 [1] : vector<4x32xf32> to vector<4xf32>
    %10 = vector.shape_cast %9 : vector<4xf32> to vector<4x1xf32>
    %cst_3 = arith.constant 0.0322580636 : f32
    %11 = vector.broadcast %cst_3 : f32 to vector<4x1xf32>
    %12 = arith.mulf %10, %11 : vector<4x1xf32>
    %13 = math.sqrt %12 : vector<4x1xf32>
    %cst_4 = arith.constant 9.99999997E-7 : f32
    %14 = vector.broadcast %cst_4 : f32 to vector<4x1xf32>
    %15 = arith.addf %13, %14 : vector<4x1xf32>
    %cst_5 = arith.constant 1.000000e+00 : f32
    %16 = vector.broadcast %cst_5 : f32 to vector<4x1xf32>
    %17 = arith.divf %16, %15 : vector<4x1xf32>
    %18 = vector.broadcast %17 : vector<4x1xf32> to vector<4x32xf32>
    %19 = arith.mulf %7, %18 : vector<4x32xf32>
    %20 = vector.extract_strided_slice %0 {offsets = [0, 32], sizes = [4, 32], strides = [1, 1]} : vector<4x128xf32> to vector<4x32xf32>
    %cst_6 = arith.constant dense<0.000000e+00> : vector<4xf32>
    %21 = vector.multi_reduction <add>, %20, %cst_6 [1] : vector<4x32xf32> to vector<4xf32>
    %22 = vector.shape_cast %21 : vector<4xf32> to vector<4x1xf32>
    %cst_7 = arith.constant 3.125000e-02 : f32
    %23 = vector.broadcast %cst_7 : f32 to vector<4x1xf32>
    %24 = arith.mulf %22, %23 : vector<4x1xf32>
    %25 = vector.broadcast %24 : vector<4x1xf32> to vector<4x32xf32>
    %26 = arith.subf %20, %25 : vector<4x32xf32>
    %27 = arith.mulf %26, %26 : vector<4x32xf32>
    %cst_8 = arith.constant dense<0.000000e+00> : vector<4xf32>
    %28 = vector.multi_reduction <add>, %27, %cst_8 [1] : vector<4x32xf32> to vector<4xf32>
    %29 = vector.shape_cast %28 : vector<4xf32> to vector<4x1xf32>
    %cst_9 = arith.constant 0.0322580636 : f32
    %30 = vector.broadcast %cst_9 : f32 to vector<4x1xf32>
    %31 = arith.mulf %29, %30 : vector<4x1xf32>
    %32 = math.sqrt %31 : vector<4x1xf32>
    %cst_10 = arith.constant 9.99999997E-7 : f32
    %33 = vector.broadcast %cst_10 : f32 to vector<4x1xf32>
    %34 = arith.addf %32, %33 : vector<4x1xf32>
    %cst_11 = arith.constant 1.000000e+00 : f32
    %35 = vector.broadcast %cst_11 : f32 to vector<4x1xf32>
    %36 = arith.divf %35, %34 : vector<4x1xf32>
    %37 = vector.broadcast %36 : vector<4x1xf32> to vector<4x32xf32>
    %38 = arith.mulf %26, %37 : vector<4x32xf32>
    %39 = vector.extract_strided_slice %0 {offsets = [0, 64], sizes = [4, 32], strides = [1, 1]} : vector<4x128xf32> to vector<4x32xf32>
    %cst_12 = arith.constant dense<0.000000e+00> : vector<4xf32>
    %40 = vector.multi_reduction <add>, %39, %cst_12 [1] : vector<4x32xf32> to vector<4xf32>
    %41 = vector.shape_cast %40 : vector<4xf32> to vector<4x1xf32>
    %cst_13 = arith.constant 3.125000e-02 : f32
    %42 = vector.broadcast %cst_13 : f32 to vector<4x1xf32>
    %43 = arith.mulf %41, %42 : vector<4x1xf32>
    %44 = vector.broadcast %43 : vector<4x1xf32> to vector<4x32xf32>
    %45 = arith.subf %39, %44 : vector<4x32xf32>
    %46 = arith.mulf %45, %45 : vector<4x32xf32>
    %cst_14 = arith.constant dense<0.000000e+00> : vector<4xf32>
    %47 = vector.multi_reduction <add>, %46, %cst_14 [1] : vector<4x32xf32> to vector<4xf32>
    %48 = vector.shape_cast %47 : vector<4xf32> to vector<4x1xf32>
    %cst_15 = arith.constant 0.0322580636 : f32
    %49 = vector.broadcast %cst_15 : f32 to vector<4x1xf32>
    %50 = arith.mulf %48, %49 : vector<4x1xf32>
    %51 = math.sqrt %50 : vector<4x1xf32>
    %cst_16 = arith.constant 9.99999997E-7 : f32
    %52 = vector.broadcast %cst_16 : f32 to vector<4x1xf32>
    %53 = arith.addf %51, %52 : vector<4x1xf32>
    %cst_17 = arith.constant 1.000000e+00 : f32
    %54 = vector.broadcast %cst_17 : f32 to vector<4x1xf32>
    %55 = arith.divf %54, %53 : vector<4x1xf32>
    %56 = vector.broadcast %55 : vector<4x1xf32> to vector<4x32xf32>
    %57 = arith.mulf %45, %56 : vector<4x32xf32>
    %58 = vector.extract_strided_slice %0 {offsets = [0, 96], sizes = [4, 32], strides = [1, 1]} : vector<4x128xf32> to vector<4x32xf32>
    %cst_18 = arith.constant dense<0.000000e+00> : vector<4xf32>
    %59 = vector.multi_reduction <add>, %58, %cst_18 [1] : vector<4x32xf32> to vector<4xf32>
    %60 = vector.shape_cast %59 : vector<4xf32> to vector<4x1xf32>
    %cst_19 = arith.constant 3.125000e-02 : f32
    %61 = vector.broadcast %cst_19 : f32 to vector<4x1xf32>
    %62 = arith.mulf %60, %61 : vector<4x1xf32>
    %63 = vector.broadcast %62 : vector<4x1xf32> to vector<4x32xf32>
    %64 = arith.subf %58, %63 : vector<4x32xf32>
    %65 = arith.mulf %64, %64 : vector<4x32xf32>
    %cst_20 = arith.constant dense<0.000000e+00> : vector<4xf32>
    %66 = vector.multi_reduction <add>, %65, %cst_20 [1] : vector<4x32xf32> to vector<4xf32>
    %67 = vector.shape_cast %66 : vector<4xf32> to vector<4x1xf32>
    %cst_21 = arith.constant 0.0322580636 : f32
    %68 = vector.broadcast %cst_21 : f32 to vector<4x1xf32>
    %69 = arith.mulf %67, %68 : vector<4x1xf32>
    %70 = math.sqrt %69 : vector<4x1xf32>
    %cst_22 = arith.constant 9.99999997E-7 : f32
    %71 = vector.broadcast %cst_22 : f32 to vector<4x1xf32>
    %72 = arith.addf %70, %71 : vector<4x1xf32>
    %cst_23 = arith.constant 1.000000e+00 : f32
    %73 = vector.broadcast %cst_23 : f32 to vector<4x1xf32>
    %74 = arith.divf %73, %72 : vector<4x1xf32>
    %75 = vector.broadcast %74 : vector<4x1xf32> to vector<4x32xf32>
    %76 = arith.mulf %64, %75 : vector<4x32xf32>
    %77 = tpu.concatenate %19, %38, %57, %76 in 1 : vector<4x32xf32>, vector<4x32xf32>, vector<4x32xf32>, vector<4x32xf32> -> vector<4x128xf32>
    %c0_24 = arith.constant 0 : index
    %c0_25 = arith.constant 0 : index
    %78 = vector.load %arg2[%c0_24, %c0_25] : memref<1x128xf32, #tpu.memory_space<vmem>>, vector<1x128xf32>
    %79 = vector.broadcast %78 : vector<1x128xf32> to vector<4x128xf32>
    %80 = arith.mulf %77, %79 : vector<4x128xf32>
    %c0_26 = arith.constant 0 : index
    %c0_27 = arith.constant 0 : index
    %81 = vector.load %arg3[%c0_26, %c0_27] : memref<1x128xf32, #tpu.memory_space<vmem>>, vector<1x128xf32>
    %82 = vector.broadcast %81 : vector<1x128xf32> to vector<4x128xf32>
    %83 = arith.addf %80, %82 : vector<4x128xf32>
    %c0_28 = arith.constant 0 : index
    %c0_29 = arith.constant 0 : index
    %84 = vector.load %arg4[%c0_28, %c0_29] : memref<4x128xf32, #tpu.memory_space<vmem>>, vector<4x128xf32>
    tpu.vector_store %arg4[%c0_28, %c0_29], %83 {strides = array<i32>} : memref<4x128xf32, #tpu.memory_space<vmem>>, vector<4x128xf32>,
    return
  }
  func.func @transform_0(%arg0: i32) -> (i32, i32) {
    %c0_i32 = arith.constant 0 : i32
    %c0_i32_0 = arith.constant 0 : i32
    return %arg0, %c0_i32 : i32, i32
  }
  func.func @transform_1(%arg0: i32) -> (i32, i32) {
    %c0_i32 = arith.constant 0 : i32
    %c0_i32_0 = arith.constant 0 : i32
    %c0_i32_1 = arith.constant 0 : i32
    return %c0_i32, %c0_i32_0 : i32, i32
  }
  func.func @transform_2(%arg0: i32) -> (i32, i32) {
    %c0_i32 = arith.constant 0 : i32
    %c0_i32_0 = arith.constant 0 : i32
    %c0_i32_1 = arith.constant 0 : i32
    return %c0_i32, %c0_i32_0 : i32, i32
  }
  func.func @transform_3(%arg0: i32) -> (i32, i32) {
    %c0_i32 = arith.constant 0 : i32
    %c0_i32_0 = arith.constant 0 : i32
    return %arg0, %c0_i32 : i32, i32
  }
}

module attributes {stable_mosaic.version = 11 : i64} {
  func.func @_addnorm_kernel(%arg0: i32, %arg1: memref<16x32xf32, #tpu.memory_space<vmem>>, %arg2: memref<1x32xf32, #tpu.memory_space<vmem>>, %arg3: memref<1x32xf32, #tpu.memory_space<vmem>>, %arg4: memref<16x32xf32, #tpu.memory_space<vmem>>) attributes {dimension_semantics = [#tpu.dimension_semantics<parallel>], iteration_bounds = array<i64: 1>, scalar_prefetch = 0 : i64, scratch_operands = 0 : i64, tpu.core_type = #tpu.core_type<tc>, window_params = [{transform_indices = @transform_0, window_bounds = array<i64: 16, 32>}, {pipeline_mode = #tpu.pipeline_mode<synchronous>, transform_indices = @transform_1, window_bounds = array<i64: 1, 32>}, {pipeline_mode = #tpu.pipeline_mode<synchronous>, transform_indices = @transform_2, window_bounds = array<i64: 1, 32>}, {transform_indices = @transform_3, window_bounds = array<i64: 16, 32>}]} {
    %c0 = arith.constant 0 : index
    %c0_0 = arith.constant 0 : index
    %0 = vector.load %arg1[%c0, %c0_0] : memref<16x32xf32, #tpu.memory_space<vmem>>, vector<16x32xf32>
    %cst = arith.constant dense<0.000000e+00> : vector<16xf32>
    %1 = vector.multi_reduction <add>, %0, %cst [1] : vector<16x32xf32> to vector<16xf32>
    %2 = vector.shape_cast %1 : vector<16xf32> to vector<16x1xf32>
    %cst_1 = arith.constant 3.200000e+01 : f32
    %3 = vector.broadcast %cst_1 : f32 to vector<16x1xf32>
    %4 = arith.divf %2, %3 : vector<16x1xf32>
    %5 = vector.broadcast %4 : vector<16x1xf32> to vector<16x32xf32>
    %6 = arith.subf %0, %5 : vector<16x32xf32>
    %7 = arith.mulf %6, %6 : vector<16x32xf32>
    %cst_2 = arith.constant dense<0.000000e+00> : vector<16xf32>
    %8 = vector.multi_reduction <add>, %7, %cst_2 [1] : vector<16x32xf32> to vector<16xf32>
    %9 = vector.shape_cast %8 : vector<16xf32> to vector<16x1xf32>
    %cst_3 = arith.constant 0.0322580636 : f32
    %10 = vector.broadcast %cst_3 : f32 to vector<16x1xf32>
    %11 = arith.mulf %9, %10 : vector<16x1xf32>
    %12 = math.sqrt %11 : vector<16x1xf32>
    %cst_4 = arith.constant 9.99999997E-7 : f32
    %13 = vector.broadcast %cst_4 : f32 to vector<16x1xf32>
    %14 = arith.addf %12, %13 : vector<16x1xf32>
    %cst_5 = arith.constant 1.000000e+00 : f32
    %15 = vector.broadcast %cst_5 : f32 to vector<16x1xf32>
    %16 = arith.divf %15, %14 : vector<16x1xf32>
    %17 = vector.broadcast %16 : vector<16x1xf32> to vector<16x32xf32>
    %18 = arith.mulf %6, %17 : vector<16x32xf32>
    %c0_6 = arith.constant 0 : index
    %c0_7 = arith.constant 0 : index
    %19 = vector.load %arg2[%c0_6, %c0_7] : memref<1x32xf32, #tpu.memory_space<vmem>>, vector<1x32xf32>
    %20 = vector.broadcast %19 : vector<1x32xf32> to vector<16x32xf32>
    %21 = arith.mulf %18, %20 : vector<16x32xf32>
    %c0_8 = arith.constant 0 : index
    %c0_9 = arith.constant 0 : index
    %22 = vector.load %arg3[%c0_8, %c0_9] : memref<1x32xf32, #tpu.memory_space<vmem>>, vector<1x32xf32>
    %23 = vector.broadcast %22 : vector<1x32xf32> to vector<16x32xf32>
    %24 = arith.addf %21, %23 : vector<16x32xf32>
    %c0_10 = arith.constant 0 : index
    %c0_11 = arith.constant 0 : index
    %25 = vector.load %arg4[%c0_10, %c0_11] : memref<16x32xf32, #tpu.memory_space<vmem>>, vector<16x32xf32>
    tpu.vector_store %arg4[%c0_10, %c0_11], %24 {strides = array<i32>} : memref<16x32xf32, #tpu.memory_space<vmem>>, vector<16x32xf32>,
    return
  }
  func.func @transform_0(%arg0: i32) -> (i32, i32) {
    %c0_i32 = arith.constant 0 : i32
    %c0_i32_0 = arith.constant 0 : i32
    return %arg0, %c0_i32 : i32, i32
  }
  func.func @transform_1(%arg0: i32) -> (i32, i32) {
    %c0_i32 = arith.constant 0 : i32
    %c0_i32_0 = arith.constant 0 : i32
    %c0_i32_1 = arith.constant 0 : i32
    return %c0_i32, %c0_i32_0 : i32, i32
  }
  func.func @transform_2(%arg0: i32) -> (i32, i32) {
    %c0_i32 = arith.constant 0 : i32
    %c0_i32_0 = arith.constant 0 : i32
    %c0_i32_1 = arith.constant 0 : i32
    return %c0_i32, %c0_i32_0 : i32, i32
  }
  func.func @transform_3(%arg0: i32) -> (i32, i32) {
    %c0_i32 = arith.constant 0 : i32
    %c0_i32_0 = arith.constant 0 : i32
    return %arg0, %c0_i32 : i32, i32
  }
}

</mosaic_0001>

<bundles_post_ra>
// kernel: tpu_custom_call.1
= control target key start
LH: loop header
LB: loop body
LE: loop exit
PB: predicated region body
PF: predicated region fallthrough
CT: control target
= control target key end

     0   :  { %8 = vsyncpa [#allocation3], 0  ;;  %s327_s0 = inlined_call_operand.hbm [shape: f32[4,128], index: 0, kind: input, shape index: {}]   ;;  %s328_s1 = inlined_call_operand.vmem [shape: f32[1,128], index: 1, kind: input, shape index: {}]   ;;  %s329_s2 = inlined_call_operand.vmem [shape: f32[1,128], index: 2, kind: input, shape index: {}]   ;;  %s330_s3 = inlined_call_operand.hbm [shape: f32[4,128], index: 3, kind: output, shape index: {}]  }
   0x1   :  { %9 = vsyncpa [#allocation4], 0  ;;  %s244_s12 = smov [#allocation2]   ;;  %s196_s16 = scalar_lea.hbm %s327_s0, 64 }
   0x2   :  { %s16_s13 = sshll.u32 %s244_s12, 4  ;;  %p197_p0 = scmp.ne.s32.totalorder %s327_s0, %s196_s16  ;;  %s17_s13 = int_to_ptr.vmem [resolvable:$true] %s16_s13 }
   0x3   :  { %p200_p1 = scmp.lt.u32.totalorder %s196_s16, %s327_s0 }
   0x5   :  { %p202_p2 = pnand %p200_p1, %p197_p0 }
   0x7   :  { %205 = shalt.err (!%p202_p2)
}
   0x8   :  { %s206_s21 = scalar_lea.vmem %s17_s13, 64  ;;  %p211_p4 = scmp.lt.s32.totalorder %s17_s13, %s17_s13 }
   0x9   :  { %p207_p3 = scmp.ne.s32.totalorder %s17_s13, %s206_s21  ;;  %p212_p5 = scmp.lt.s32.totalorder %s206_s21, %s206_s21 }
   0xb   :  { %p213_p6 = por %p212_p5, %p211_p4 }
   0xd   :  { %p214_p7 = pnand %p213_p6, %p207_p3 }
   0xf   :  { %217 = shalt.err (!%p214_p7)
}
  0x10   :  { %19 = dma.hbm_to_vmem [thread:$0]  %s327_s0, 64, %s17_s13, [#allocation3]  }
  0x11   :  { %240 = dma.done.wait [#allocation3], 64  }
  0x12   :  { %241 = vsyncadd [#allocation3], 4294967232  ;;  %v27_v0 = vld [vmem:[#allocation2] sm:$0xf]  ;;  %s245_s24 = smov 96   ;;  %s246_s25 = smov 32  }
  0x13   :  { %51 = vrot.lane.b32.xlu0 %v27_v0, %s245_s24  ;;  %107 = vrot.lane.b32.xlu1 %v27_v0, %s246_s25  ;;  %s247_s26 = smov 64   ;;  %vm28_vm0 = vcmask 257024   ;;  %vm135_vm9 = vcmask 261120   ;;  %vm137_vm10 = vcmask 523264   ;;  %vm139_vm11 = vcmask 785408   ;;  %s248_s30 = smov [#allocation5]  }
  0x14   :  { %v29_v3 = vsel %vm28_vm0, %v27_v0, 0.0  ;;  %s164_s4 = sshll.u32 %s248_s30, 4  ;;  %s165_s4 = int_to_ptr.vmem [resolvable:$true] %s164_s4 }
  0x15   :  { %s218_s5 = scalar_lea.vmem %s165_s4, 64  ;;  %p223_p9 = scmp.lt.s32.totalorder %s165_s4, %s165_s4 }
  0x16   :  { %p219_p8 = scmp.ne.s32.totalorder %s165_s4, %s218_s5  ;;  %p224_p10 = scmp.lt.s32.totalorder %s218_s5, %s218_s5 }
  0x17   :  { %79 = vrot.lane.b32.xlu0 %v27_v0, %s247_s26 }
  0x18   :  { %p225_p11 = por %p224_p10, %p223_p9 }
  0x1a   :  { %p226_p12 = pnand %p225_p11, %p219_p8 }
  0x85   :  { %v52_v1 = vpop.permute.xlu0 %51  ;;  %v108_v5 = vpop.permute.xlu1 %107 }
  0x86   :  { %v54_v2 = vsel %vm28_vm0, %v52_v1, 0.0  ;;  %v110_v7 = vsel %vm28_vm0, %v108_v5, 0.0 }
  0x87   :  { %55 = vadd.xlane.f32.xlu1 %v54_v2 }
  0x89   :  { %v80_v4 = vpop.permute.xlu0 %79 }
  0x8a   :  { %v82_v6 = vsel %vm28_vm0, %v80_v4, 0.0 }
  0x8b   :  { %83 = vadd.xlane.f32.xlu0 %v82_v6  ;;  %30 = vadd.xlane.f32.xlu1 %v29_v3 }
  0x8f   :  { %111 = vadd.xlane.f32.xlu0 %v110_v7 }
 0x114   :  { %v56_v8 = vpop.xlane.xlu1 %55 }
 0x115   :  { %v57_v9 = vmul.f32 0.03125, %v56_v8  ;;  %v173_v8 = vld [vmem:[%s328_s1] ss:$0 sm:$0xff] }
 0x117   :  { %v285_v10 = vsub.f32 %v27_v0, %v57_v9 }
 0x118   :  { %v84_v11 = vpop.xlane.xlu0 %83  ;;  %v31_v20 = vpop.xlane.xlu1 %30 }
 0x119   :  { %v85_v12 = vmul.f32 0.03125, %v84_v11  ;;  %v59_v13 = vmul.f32 %v285_v10, %v285_v10  ;;  %v32_v21 = vmul.f32 0.03125, %v31_v20 }
 0x11b   :  { %v289_v14 = vsub.f32 %v27_v0, %v85_v12  ;;  %61 = vrot.lane.b32.xlu0 %v59_v13, %s245_s24  ;;  %v297_v22 = vsub.f32 %v27_v0, %v32_v21 }
 0x11c   :  { %v112_v15 = vpop.xlane.xlu0 %111 }
 0x11d   :  { %v113_v16 = vmul.f32 0.03125, %v112_v15  ;;  %v87_v17 = vmul.f32 %v289_v14, %v289_v14  ;;  %v34_v23 = vmul.f32 %v297_v22, %v297_v22 }
 0x11f   :  { %v293_v18 = vsub.f32 %v27_v0, %v113_v16  ;;  %89 = vrot.lane.b32.xlu1 %v87_v17, %s247_s26  ;;  %v35_v24 = vsel %vm28_vm0, %v34_v23, 0.0 }
 0x121   :  { %v115_v19 = vmul.f32 %v293_v18, %v293_v18 }
 0x123   :  { %117 = vrot.lane.b32.xlu1 %v115_v19, %s246_s25 }
 0x13a   :  { %36 = vadd.xlane.f32.xlu0 %v35_v24 }
 0x18d   :  { %v62_v25 = vpop.permute.xlu0 %61 }
 0x18e   :  { %v64_v26 = vsel %vm28_vm0, %v62_v25, 0.0 }
 0x18f   :  { %65 = vadd.xlane.f32.xlu1 %v64_v26 }
 0x191   :  { %v90_v27 = vpop.permute.xlu1 %89 }
 0x192   :  { %v92_v28 = vsel %vm28_vm0, %v90_v27, 0.0 }
 0x193   :  { %93 = vadd.xlane.f32.xlu0 %v92_v28 }
 0x195   :  { %v118_v29 = vpop.permute.xlu1 %117 }
 0x196   :  { %v120_v30 = vsel %vm28_vm0, %v118_v29, 0.0 }
 0x197   :  { %121 = vadd.xlane.f32.xlu0 %v120_v30 }
 0x1c7   :  { %v37_v31 = vpop.xlane.xlu0 %36 }
 0x1c8   :  { %v38_v32 = vmul.f32 0.032258064, %v37_v31 }
 0x1ca   :  { %180 = vrsqrt.f32 %v38_v32  ;;  %vm41_vm1 = vcmp.eq.f32.partialorder %v38_v32, inf  ;;  %v44_v41 = vand.u32 2147483648, %v38_v32  ;;  %vm43_vm2 = vcmp.eq.f32.partialorder %v38_v32, 0.0 }
 0x1d4   :  { %v181_v37 = vpop.eup %180 }
 0x1d5   :  { %v40_v39 = vmul.f32 %v181_v37, %v38_v32 }
 0x1d7   :  { %v42_v43 = vsel %vm41_vm1, %v38_v32, %v40_v39 }
 0x1d8   :  { %v45_v46 = vsel %vm43_vm2, %v44_v41, %v42_v43 }
 0x1d9   :  { %v46_v52 = vadd.f32 1e-06, %v45_v46 }
 0x21c   :  { %v66_v33 = vpop.xlane.xlu1 %65 }
 0x21d   :  { %v67_v34 = vmul.f32 0.032258064, %v66_v33 }
 0x21f   :  { %182 = vrsqrt.f32 %v67_v34  ;;  %vm70_vm3 = vcmp.eq.f32.partialorder %v67_v34, inf  ;;  %v73_v45 = vand.u32 2147483648, %v67_v34  ;;  %vm72_vm4 = vcmp.eq.f32.partialorder %v67_v34, 0.0 }
 0x220   :  { %v94_v35 = vpop.xlane.xlu0 %93 }
 0x221   :  { %v95_v36 = vmul.f32 0.032258064, %v94_v35 }
 0x223   :  { %184 = vrsqrt.f32 %v95_v36  ;;  %vm98_vm5 = vcmp.eq.f32.partialorder %v95_v36, inf  ;;  %v101_v53 = vand.u32 2147483648, %v95_v36  ;;  %vm100_vm6 = vcmp.eq.f32.partialorder %v95_v36, 0.0 }
 0x224   :  { %v122_v38 = vpop.xlane.xlu0 %121 }
 0x225   :  { %v123_v40 = vmul.f32 0.032258064, %v122_v38 }
 0x227   :  { %186 = vrsqrt.f32 %v123_v40  ;;  %vm126_vm7 = vcmp.eq.f32.partialorder %v123_v40, inf  ;;  %v129_v59 = vand.u32 2147483648, %v123_v40  ;;  %vm128_vm8 = vcmp.eq.f32.partialorder %v123_v40, 0.0 }
 0x229   :  { %v183_v42 = vpop.eup %182 }
 0x22a   :  { %v69_v44 = vmul.f32 %v183_v42, %v67_v34 }
 0x22c   :  { %v71_v47 = vsel %vm70_vm3, %v67_v34, %v69_v44 }
 0x22d   :  { %v185_v48 = vpop.eup %184  ;;  %v74_v49 = vsel %vm72_vm4, %v73_v45, %v71_v47 }
 0x22e   :  { %v75_v50 = vadd.f32 1e-06, %v74_v49  ;;  %v97_v51 = vmul.f32 %v185_v48, %v95_v36 }
 0x230   :  { %v99_v54 = vsel %vm98_vm5, %v95_v36, %v97_v51  ;;  %188 = vrcp.f32 %v75_v50 }
 0x231   :  { %v187_v55 = vpop.eup %186  ;;  %v102_v56 = vsel %vm100_vm6, %v101_v53, %v99_v54  ;;  %190 = vrcp.f32 %v46_v52 }
 0x232   :  { %v103_v57 = vadd.f32 1e-06, %v102_v56  ;;  %v125_v58 = vmul.f32 %v187_v55, %v123_v40 }
 0x234   :  { %192 = vrcp.f32 %v103_v57  ;;  %v127_v60 = vsel %vm126_vm7, %v123_v40, %v125_v58 }
 0x235   :  { %v130_v61 = vsel %vm128_vm8, %v129_v59, %v127_v60 }
 0x236   :  { %v131_v62 = vadd.f32 1e-06, %v130_v61 }
 0x238   :  { %194 = vrcp.f32 %v131_v62 }
 0x23a   :  { %v189_v63 = vpop.eup %188 }
 0x23b   :  { %v191_v0 = vpop.eup %190  ;;  %v78_v2 = vmul.f32 %v189_v63, %v285_v10  ;;  %v174_v10 = vld [vmem:[%s329_s2] ss:$0 sm:$0xff] }
 0x23c   :  { %v49_v4 = vmul.f32 %v191_v0, %v297_v22 }
 0x23e   :  { %v193_v1 = vpop.eup %192  ;;  %v136_v7 = vsel %vm135_vm9, %v49_v4, %v78_v2 }
 0x23f   :  { %v106_v3 = vmul.f32 %v193_v1, %v289_v14 }
 0x241   :  { %v138_v9 = vsel %vm137_vm10, %v136_v7, %v106_v3 }
 0x242   :  { %v195_v5 = vpop.eup %194 }
 0x243   :  { %v134_v6 = vmul.f32 %v195_v5, %v293_v18 }
 0x245   :  { %v140_v11 = vsel %vm139_vm11, %v138_v9, %v134_v6 }
 0x246   :  { %v148_v12 = vmul.f32 %v173_v8, %v140_v11 }
 0x248   :  { %v156_v13 = vadd.f32 %v174_v10, %v148_v12 }
 0x24a   :  { %157 = vst [vmem:[#allocation5] sm:$0xf] %v156_v13 }
 0x24b   :  { %229 = shalt.err (!%p226_p12)
}
 0x24c   :  { %s230_s7 = scalar_lea.hbm %s330_s3, 64 }
 0x24d   :  { %p231_p13 = scmp.ne.s32.totalorder %s330_s3, %s230_s7  ;;  %p234_p0 = scmp.lt.u32.totalorder %s230_s7, %s330_s3 }
 0x24f   :  { %p236_p1 = pnand %p234_p0, %p231_p13 }
 0x251   :  { %239 = shalt.err (!%p236_p1)
}
 0x252   :  { %167 = dma.vmem_to_hbm [thread:$0]  %s165_s4, 64, %s330_s3, [#allocation4]  }
 0x253   :  { %242 = dma.done.wait [#allocation4], 64  }
 0x254   :  { %243 = vsyncadd [#allocation4], 4294967232 }
 0x255   :  { %171 = vsyncpa [#allocation3], 1 }
 0x256   :  { %172 = vsyncpa [#allocation4], 1 }

// kernel: tpu_custom_call.1
= control target key start
LH: loop header
LB: loop body
LE: loop exit
PB: predicated region body
PF: predicated region fallthrough
CT: control target
= control target key end

     0   :  { %8 = vsyncpa [#allocation3], 0  ;;  %s240_s0 = inlined_call_operand.hbm [shape: f32[16,32], index: 0, kind: input, shape index: {}]   ;;  %s241_s1 = inlined_call_operand.vmem [shape: f32[1,32], index: 1, kind: input, shape index: {}]   ;;  %s242_s2 = inlined_call_operand.vmem [shape: f32[1,32], index: 2, kind: input, shape index: {}]   ;;  %s243_s3 = inlined_call_operand.hbm [shape: f32[16,32], index: 3, kind: output, shape index: {}]  }
   0x1   :  { %9 = vsyncpa [#allocation4], 0  ;;  %s174_s12 = smov [#allocation2]   ;;  %s126_s16 = scalar_lea.hbm %s240_s0, 256 }
   0x2   :  { %s15_s13 = sshll.u32 %s174_s12, 4  ;;  %p127_p0 = scmp.ne.s32.totalorder %s240_s0, %s126_s16  ;;  %s16_s13 = int_to_ptr.vmem [resolvable:$true] %s15_s13 }
   0x3   :  { %p130_p1 = scmp.lt.u32.totalorder %s126_s16, %s240_s0 }
   0x5   :  { %p132_p2 = pnand %p130_p1, %p127_p0 }
   0x7   :  { %135 = shalt.err (!%p132_p2)
}
   0x8   :  { %s136_s21 = scalar_lea.vmem %s16_s13, 256  ;;  %p141_p4 = scmp.lt.s32.totalorder %s16_s13, %s16_s13 }
   0x9   :  { %p137_p3 = scmp.ne.s32.totalorder %s16_s13, %s136_s21  ;;  %p142_p5 = scmp.lt.s32.totalorder %s136_s21, %s136_s21 }
   0xb   :  { %p143_p6 = por %p142_p5, %p141_p4 }
   0xd   :  { %p144_p7 = pnand %p143_p6, %p137_p3 }
   0xf   :  { %147 = shalt.err (!%p144_p7)
}
  0x10   :  { %s175_s22 = smov 128   ;;  %s176_s23 = smov 8  }
  0x11   :  { %21 = dma.hbm_to_vmem [thread:$0]  %s240_s0, 256, %s16_s13, [#allocation3], %s175_s22, %s175_s22, %s176_s23  }
  0x12   :  { %170 = dma.done.wait [#allocation3], 256  }
  0x13   :  { %171 = vsyncadd [#allocation3], 4294967040  ;;  %vm31_vm0 = vcmask 261120   ;;  %v29_v0 = vld [vmem:[#allocation2] sm:$0xff]  ;;  %v30_v1 = vld [vmem:[#allocation2 + $0x8] sm:$0xff]  ;;  %s177_s29 = smov [#allocation5]  }
  0x14   :  { %v32_v2 = vsel %vm31_vm0, %v29_v0, 0.0  ;;  %v35_v3 = vsel %vm31_vm0, %v30_v1, 0.0  ;;  %v112_v31 = vld [vmem:[%s241_s1] ss:$0 sm:$0xff]  ;;  %s100_s30 = sshll.u32 %s177_s29, 4  ;;  %s101_s30 = int_to_ptr.vmem [resolvable:$true] %s100_s30 }
  0x15   :  { %33 = vadd.xlane.f32.xlu0 %v32_v2  ;;  %v113_v33 = vld [vmem:[%s242_s2] ss:$0 sm:$0xff]  ;;  %s148_s4 = scalar_lea.vmem %s101_s30, 256  ;;  %p153_p9 = scmp.lt.s32.totalorder %s101_s30, %s101_s30 }
  0x16   :  { %p149_p8 = scmp.ne.s32.totalorder %s101_s30, %s148_s4  ;;  %p154_p10 = scmp.lt.s32.totalorder %s148_s4, %s148_s4 }
  0x18   :  { %p155_p11 = por %p154_p10, %p153_p9 }
  0x19   :  { %36 = vadd.xlane.f32.xlu0 %v35_v3 }
  0x1a   :  { %p156_p12 = pnand %p155_p11, %p149_p8 }
  0xa2   :  { %v34_v4 = vpop.xlane.xlu0 %33 }
  0xa3   :  { %v39_v5 = vmul.f32 0.03125, %v34_v4 }
  0xa5   :  { %v41_v6 = vsub.f32 %v29_v0, %v39_v5 }
  0xa6   :  { %v37_v7 = vpop.xlane.xlu0 %36 }
  0xa7   :  { %v40_v8 = vmul.f32 0.03125, %v37_v7  ;;  %v43_v9 = vmul.f32 %v41_v6, %v41_v6 }
  0xa9   :  { %v42_v10 = vsub.f32 %v30_v1, %v40_v8  ;;  %v45_v11 = vsel %vm31_vm0, %v43_v9, 0.0 }
  0xaa   :  { %46 = vadd.xlane.f32.xlu1 %v45_v11 }
  0xab   :  { %v44_v12 = vmul.f32 %v42_v10, %v42_v10 }
  0xad   :  { %v48_v13 = vsel %vm31_vm0, %v44_v12, 0.0 }
  0xae   :  { %49 = vadd.xlane.f32.xlu1 %v48_v13 }
 0x137   :  { %v47_v14 = vpop.xlane.xlu1 %46 }
 0x138   :  { %v51_v15 = vmul.f32 0.032258064, %v47_v14 }
 0x13a   :  { %118 = vrsqrt.f32 %v51_v15  ;;  %vm55_vm1 = vcmp.eq.f32.partialorder %v51_v15, inf  ;;  %v58_v20 = vand.u32 2147483648, %v51_v15  ;;  %vm57_vm2 = vcmp.eq.f32.partialorder %v51_v15, 0.0 }
 0x13b   :  { %v50_v16 = vpop.xlane.xlu1 %49 }
 0x13c   :  { %v52_v17 = vmul.f32 0.032258064, %v50_v16 }
 0x13e   :  { %120 = vrsqrt.f32 %v52_v17  ;;  %vm62_vm3 = vcmp.eq.f32.partialorder %v52_v17, inf  ;;  %v65_v26 = vand.u32 2147483648, %v52_v17  ;;  %vm64_vm4 = vcmp.eq.f32.partialorder %v52_v17, 0.0 }
 0x144   :  { %v119_v18 = vpop.eup %118 }
 0x145   :  { %v54_v19 = vmul.f32 %v119_v18, %v51_v15 }
 0x147   :  { %v56_v21 = vsel %vm55_vm1, %v51_v15, %v54_v19 }
 0x148   :  { %v121_v22 = vpop.eup %120  ;;  %v59_v23 = vsel %vm57_vm2, %v58_v20, %v56_v21 }
 0x149   :  { %v67_v24 = vadd.f32 1e-06, %v59_v23  ;;  %v61_v25 = vmul.f32 %v121_v22, %v52_v17 }
 0x14b   :  { %122 = vrcp.f32 %v67_v24  ;;  %v63_v27 = vsel %vm62_vm3, %v52_v17, %v61_v25 }
 0x14c   :  { %v66_v28 = vsel %vm64_vm4, %v65_v26, %v63_v27 }
 0x14d   :  { %v68_v29 = vadd.f32 1e-06, %v66_v28 }
 0x14f   :  { %124 = vrcp.f32 %v68_v29 }
 0x155   :  { %v123_v30 = vpop.eup %122 }
 0x156   :  { %v73_v32 = vmul.f32 %v123_v30, %v41_v6 }
 0x158   :  { %v82_v34 = vmul.f32 %v112_v31, %v73_v32 }
 0x159   :  { %v125_v35 = vpop.eup %124 }
 0x15a   :  { %v74_v36 = vmul.f32 %v125_v35, %v42_v10  ;;  %v91_v37 = vadd.f32 %v113_v33, %v82_v34 }
 0x15c   :  { %v83_v38 = vmul.f32 %v112_v31, %v74_v36  ;;  %93 = vst.msk [vmem:[#allocation5] sm:$0xff] %vm31_vm0, %v91_v37 }
 0x15e   :  { %v92_v39 = vadd.f32 %v113_v33, %v83_v38 }
 0x160   :  { %94 = vst.msk [vmem:[#allocation5 + $0x8] sm:$0xff] %vm31_vm0, %v92_v39 }
 0x161   :  { %159 = shalt.err (!%p156_p12)
}
 0x162   :  { %s160_s5 = scalar_lea.hbm %s243_s3, 256 }
 0x163   :  { %p161_p13 = scmp.ne.s32.totalorder %s243_s3, %s160_s5  ;;  %p164_p0 = scmp.lt.u32.totalorder %s160_s5, %s243_s3 }
 0x165   :  { %p166_p1 = pnand %p164_p0, %p161_p13 }
 0x167   :  { %169 = shalt.err (!%p166_p1)
}
 0x168   :  { %106 = dma.vmem_to_hbm [thread:$0]  %s101_s30, 256, %s243_s3, [#allocation4], %s175_s22, %s175_s22, %s176_s23  }
 0x169   :  { %172 = dma.done.wait [#allocation4], 256  }
 0x16a   :  { %173 = vsyncadd [#allocation4], 4294967040 }
 0x16b   :  { %110 = vsyncpa [#allocation3], 1 }
 0x16c   :  { %111 = vsyncpa [#allocation4], 1 }

</bundles_post_ra>
